<compile_context>
chip_gen: v5e
topology: v5e:2x2
jax: 0.10.0
libtpu: 0.0.40
codegen_flags: <defaults>
</compile_context>

<pallas_src>
import jax
import jax.numpy as jnp
import numpy as np
from jax.experimental import pallas as pl
from jax.experimental.pallas import tpu as pltpu

# ----------------------------- synthetic circuit config -----------------------------
N_QUBITS = 7                     # D = 128 -> one full lane of the vreg
DIM = 2 ** N_QUBITS
ANSATZE_DEPTH = 3                # RY layer, CNOT layer, RY layer
OBSERVE_BITS = (0, 1)            # Pauli-Z observation on qubits 0 and 1
K_OBS = len(OBSERVE_BITS)
INPUT_SCALING = float(np.pi)
OUT_LANES = 128                  # lane-dense padded output width ([e0 | e1 | zeros])
SMALL_BATCH = 8                  # below this, plain XLA beats a pallas_call dispatch
MAX_TB = 1024                    # batch-tile cap (VMEM stays tiny even double-buffered)

# ----------------------------- static (numpy) constants -----------------------------
_I2_NP = np.eye(2, dtype=np.float32)
_X2_NP = np.array([[0.0, 1.0], [1.0, 0.0]], np.float32)
_P0_NP = np.array([[1.0, 0.0], [0.0, 0.0]], np.float32)
_P1_NP = np.array([[0.0, 0.0], [0.0, 1.0]], np.float32)
_CNOT_NP = np.kron(_P0_NP, _I2_NP) + np.kron(_P1_NP, _X2_NP)   # control = upper qubit


def _np_kron_all(mats):
    out = np.array([[1.0]], np.float32)
    for m in mats:
        out = np.kron(out, m)
    return out


# ansatze depth 1: CNOT entanglers on (0,1),(2,3),(4,5), identity on qubit 6 (constant).
# It is a symmetric permutation (involution): apply it as a static row gather.
_CNOT_LAYER_NP = _np_kron_all([_CNOT_NP, _CNOT_NP, _CNOT_NP, _I2_NP])   # (D, D)
_CNOT_PERM_NP = np.argmax(_CNOT_LAYER_NP, axis=1).astype(np.int32)      # (D,)

# Bit tables for vectorized kron-free construction (qubit 0 = most-significant bit).
_BITS_NP = (
    (np.arange(DIM)[None, :] >> (N_QUBITS - 1 - np.arange(N_QUBITS)[:, None])) & 1
).astype(np.float32)                                                     # (Q, D)
_EQ_NP = (_BITS_NP[:, :, None] == _BITS_NP[:, None, :]).astype(np.float32)   # (Q, D, D)
_DIFF_NP = (_BITS_NP[:, :, None] - _BITS_NP[:, None, :]).astype(np.float32)  # (Q, D, D)


def _build_mask_np():
    """Diagonal Pauli-Z projector masks, packed into a lane-dense (D, 128) matrix.

    Columns [0..K) are diag(P0) for each observed qubit, columns [K..2K) are diag(P1).
    Remaining columns are zero padding so the kernel output is a full 128-lane store.
    """
    mask = np.zeros((DIM, OUT_LANES), np.float32)
    for k, b in enumerate(OBSERVE_BITS):
        bit = _BITS_NP[b]
        mask[:, k] = (bit == 0).astype(np.float32)           # P0 diagonal
        mask[:, K_OBS + k] = (bit == 1).astype(np.float32)   # P1 diagonal
    return mask


_MASK_NP = _build_mask_np()


# ----------------------------- per-call (trainable) glue -----------------------------
def _ry_layer_unitary_T(thetas):
    """Transposed kron_q RY(theta_q), built without a kron chain.

    U^T[i, j] = prod_q ( cos(t_q/2) * [bit_i_q == bit_j_q] - sin(t_q/2) * (bit_i_q - bit_j_q) )
    -> 7 full-size (D, D) broadcast multiplies instead of 7 tiny serialized krons.
    """
    half = thetas.astype(jnp.float32) * 0.5
    c = jnp.cos(half)[:, None, None]
    s = jnp.sin(half)[:, None, None]
    factors = c * jnp.asarray(_EQ_NP) - s * jnp.asarray(_DIFF_NP)   # (Q, D, D)
    return jnp.prod(factors, axis=0)                                 # (D, D)


def _combined_unitary_T(ansatze_params):
    """W = U_ry0^T @ P_cnot @ U_ry1^T; the CNOT layer is applied as a static row gather."""
    u0t = _ry_layer_unitary_T(ansatze_params[0])
    u1t = _ry_layer_unitary_T(ansatze_params[1])
    u1t_perm = jnp.take(u1t, jnp.asarray(_CNOT_PERM_NP), axis=0)     # P @ u1t
    return jnp.dot(u0t, u1t_perm, preferred_element_type=jnp.float32)


def _encoded_states(inputs_2d):
    """RY(x*pi)-encoding of |0...0> is a product state: state[i] = prod_q (c_q or s_q by bit)."""
    half = inputs_2d.astype(jnp.float32) * (INPUT_SCALING * 0.5)      # (B, Q)
    bits = jnp.asarray(_BITS_NP)                                      # (Q, D)
    c = jnp.cos(half)[:, :, None]                                     # (B, Q, 1)
    s = jnp.sin(half)[:, :, None]
    factors = c * (1.0 - bits)[None] + s * bits[None]                 # (B, Q, D)
    return jnp.prod(factors, axis=1)                                  # (B, D)


# ---------------------------------- Pallas kernel ------------------------------------
def _qnet_kernel(w_ref, s_ref, mask_ref, out_ref):
    # One evolution matmul through the pre-combined real circuit unitary (row-vector
    # form: s <- s @ W), then Pauli-Z expectations <psi|P|psi> = probs @ 0/1 mask.
    # Lane-dense output columns: [e0(bit0), e0(bit1), e1(bit0), e1(bit1), 0...].
    s = jnp.dot(s_ref[...], w_ref[...], preferred_element_type=jnp.float32)   # (TB, D)
    probs = s * s
    out_ref[...] = jnp.dot(probs, mask_ref[...], preferred_element_type=jnp.float32)


# ---------------------------------- wrappers ------------------------------------------
def _choose_tiling(batch):
    """Pick (tb, padded_batch). Big tiles amortize per-step overhead; large batches keep
    >= 2 grid steps so v7x megacore feeds both TensorCores."""
    b8 = ((batch + 7) // 8) * 8
    if b8 <= 256:
        return b8, b8                           # single step; dispatch-bound regime
    n_steps = max(2, pl.cdiv(b8, MAX_TB))
    tb = ((pl.cdiv(b8, n_steps) + 7) // 8) * 8
    return tb, n_steps * tb


@jax.jit
def _qnet_forward_pallas(inputs_2d, ansatze_params):
    """inputs_2d: (B, N_QUBITS) f32; ansatze_params: (2, N_QUBITS) f32 -> ((B,K),(B,K))."""
    B = inputs_2d.shape[0]

    states = _encoded_states(inputs_2d)                    # (B, D) tiny O(B*D) glue
    w = _combined_unitary_T(ansatze_params)                # (D, D) once per call
    mask = jnp.asarray(_MASK_NP)                           # (D, 128)

    tb, b_pad = _choose_tiling(B)
    if b_pad != B:
        states = jnp.pad(states, ((0, b_pad - B), (0, 0)))

    out = pl.pallas_call(
        _qnet_kernel,
        out_shape=jax.ShapeDtypeStruct((b_pad, OUT_LANES), jnp.float32),
        grid_spec=pltpu.PrefetchScalarGridSpec(
            num_scalar_prefetch=0,
            grid=(b_pad // tb,),
            in_specs=[
                pl.BlockSpec((DIM, DIM), lambda b: (0, 0)),        # shared combined unitary
                pl.BlockSpec((tb, DIM), lambda b: (b, 0)),         # per-tile states
                pl.BlockSpec((DIM, OUT_LANES), lambda b: (0, 0)),  # shared Z masks
            ],
            out_specs=pl.BlockSpec((tb, OUT_LANES), lambda b: (b, 0)),
        ),
        compiler_params=pltpu.CompilerParams(dimension_semantics=("parallel",)),
    )(w, states, mask)

    e0 = out[:B, :K_OBS]
    e1 = out[:B, K_OBS:2 * K_OBS]
    return e0, e1


@jax.jit
def _qnet_forward_xla(inputs_2d, ansatze_params):
    """Pure-XLA path for tiny batches / the single-sample module signature."""
    states = _encoded_states(inputs_2d)
    w = _combined_unitary_T(ansatze_params)
    s = jnp.dot(states, w, preferred_element_type=jnp.float32)
    probs = s * s
    out = jnp.dot(probs, jnp.asarray(_MASK_NP[:, :2 * K_OBS]),
                  preferred_element_type=jnp.float32)
    return out[:, :K_OBS], out[:, K_OBS:2 * K_OBS]


def qnet_forward(inputs, ansatze_params):
    """Matches the torch module's forward: single (N_QUBITS,) input -> (e0, e1) each (K,).
    Also accepts a batch (B, N_QUBITS) -> (B, K) each."""
    inputs = jnp.asarray(inputs, jnp.float32)
    ansatze_params = jnp.asarray(ansatze_params, jnp.float32)
    if inputs.ndim == 1:
        e0, e1 = _qnet_forward_xla(inputs[None, :], ansatze_params)
        return e0[0], e1[0]
    if inputs.shape[0] < SMALL_BATCH:
        return _qnet_forward_xla(inputs, ansatze_params)
    return _qnet_forward_pallas(inputs, ansatze_params)


# ------------------------------ pure-JAX complex reference ---------------------------
# Mirrors the original torch module: full complex layer unitaries (including the
# encoder layer) and explicit projector matmuls <psi|P|psi>.
_I2_C = jnp.eye(2, dtype=jnp.complex64)
_P0_C = jnp.array([[1, 0], [0, 0]], jnp.complex64)
_P1_C = jnp.array([[0, 0], [0, 1]], jnp.complex64)
_X2_C = jnp.array([[0, 1], [1, 0]], jnp.complex64)
_CNOT_C = jnp.kron(_P0_C, _I2_C) + jnp.kron(_P1_C, _X2_C)


def _ry_c(theta):
    c = jnp.cos(theta / 2.0)
    s = jnp.sin(theta / 2.0)
    return jnp.stack([jnp.stack([c, -s]), jnp.stack([s, c])]).astype(jnp.complex64)


def _kron_all_c(mats):
    out = jnp.array([[1.0]], jnp.complex64)
    for m in mats:
        out = jnp.kron(out, m)
    return out


def qnet_forward_ref(single_input, ansatze_params):
    layers = [
        _kron_all_c([_ry_c(single_input[q] * INPUT_SCALING) for q in range(N_QUBITS)]),
        _kron_all_c([_ry_c(ansatze_params[0, q]) for q in range(N_QUBITS)]),
        _kron_all_c([_CNOT_C, _CNOT_C, _CNOT_C, _I2_C]),
        _kron_all_c([_ry_c(ansatze_params[1, q]) for q in range(N_QUBITS)]),
    ]
    state = jnp.zeros((DIM, 1), jnp.complex64).at[0, 0].set(1.0)
    for u in layers:
        state = u @ state
    bra = jnp.conjugate(state).T
    e0, e1 = [], []
    for b in OBSERVE_BITS:
        m0 = [_I2_C] * N_QUBITS
        m1 = [_I2_C] * N_QUBITS
        m0[b] = _P0_C
        m1[b] = _P1_C
        e0.append(jnp.real(bra @ _kron_all_c(m0) @ state)[0, 0])
        e1.append(jnp.real(bra @ _kron_all_c(m1) @ state)[0, 0])
    return jnp.stack(e0), jnp.stack(e1)


if __name__ == "__main__":
    key = jax.random.PRNGKey(0)
    k_in, k_par = jax.random.split(key)
    B = 16
    # inputs: (B, qubit_num); each row is what the module's forward expects
    inputs = jax.random.uniform(k_in, (B, N_QUBITS), jnp.float32, minval=-1.0, maxval=1.0)
    # ansatze params: uniform in (-pi/circuit_depth, pi/circuit_depth), deterministic
    lim = float(np.pi) / ANSATZE_DEPTH
    ansatze_params = jax.random.uniform(k_par, (2, N_QUBITS), jnp.float32,
                                        minval=-lim, maxval=lim)

    # batched Pallas kernel call (one pallas_call for all B samples)
    e0, e1 = qnet_forward(inputs, ansatze_params)
    jax.block_until_ready((e0, e1))

    # pure-XLA path (used for tiny batches / single-sample) must agree on the full batch
    f0, f1 = _qnet_forward_xla(inputs, ansatze_params)
    jax.block_until_ready((f0, f1))
    assert np.allclose(np.asarray(e0), np.asarray(f0), atol=1e-5)
    assert np.allclose(np.asarray(e1), np.asarray(f1), atol=1e-5)

    # single-sample call, matching the torch module's forward signature
    e0_s, e1_s = qnet_forward(inputs[0], ansatze_params)
    jax.block_until_ready((e0_s, e1_s))
    assert np.allclose(np.asarray(e0_s), np.asarray(e0[0]), atol=1e-5)
    assert np.allclose(np.asarray(e1_s), np.asarray(e1[0]), atol=1e-5)

    # validate a few rows against the full complex-unitary reference (original semantics)
    for i in range(4):
        r0, r1 = qnet_forward_ref(inputs[i], ansatze_params)
        assert np.allclose(np.asarray(e0[i]), np.asarray(r0), atol=1e-4), (i, e0[i], r0)
        assert np.allclose(np.asarray(e1[i]), np.asarray(r1), atol=1e-4), (i, e1[i], r1)
    print("KERNEL_OK")
</pallas_src>

<mosaic_0001>
module attributes {stable_mosaic.version = 11 : i64} {
  func.func @_qnet_kernel(%arg0: i32, %arg1: memref<128x128xf32, #tpu.memory_space<vmem>>, %arg2: memref<16x128xf32, #tpu.memory_space<vmem>>, %arg3: memref<128x128xf32, #tpu.memory_space<vmem>>, %arg4: memref<16x128xf32, #tpu.memory_space<vmem>>) attributes {dimension_semantics = [#tpu.dimension_semantics<parallel>], iteration_bounds = array<i64: 1>, scalar_prefetch = 0 : i64, scratch_operands = 0 : i64, tpu.core_type = #tpu.core_type<tc>, window_params = [{pipeline_mode = #tpu.pipeline_mode<synchronous>, transform_indices = @transform_0, window_bounds = array<i64: 128, 128>}, {transform_indices = @transform_1, window_bounds = array<i64: 16, 128>}, {pipeline_mode = #tpu.pipeline_mode<synchronous>, transform_indices = @transform_2, window_bounds = array<i64: 128, 128>}, {transform_indices = @transform_3, window_bounds = array<i64: 16, 128>}]} {
    %c0 = arith.constant 0 : index
    %c0_0 = arith.constant 0 : index
    %0 = vector.load %arg2[%c0, %c0_0] : memref<16x128xf32, #tpu.memory_space<vmem>>, vector<16x128xf32>
    %c0_1 = arith.constant 0 : index
    %c0_2 = arith.constant 0 : index
    %1 = vector.load %arg1[%c0_1, %c0_2] : memref<128x128xf32, #tpu.memory_space<vmem>>, vector<128x128xf32>
    %cst = arith.constant dense<0.000000e+00> : vector<16x128xf32>
    %2 = tpu.matmul %0, %1, %cst {dimension_numbers = #tpu.dot_dimension_numbers<[1], [0], [0], [1], [0, 0, 1, 1], [], []>} : vector<16x128xf32>, vector<128x128xf32>, vector<16x128xf32> -> vector<16x128xf32>
    %3 = arith.mulf %2, %2 : vector<16x128xf32>
    %c0_3 = arith.constant 0 : index
    %c0_4 = arith.constant 0 : index
    %4 = vector.load %arg3[%c0_3, %c0_4] : memref<128x128xf32, #tpu.memory_space<vmem>>, vector<128x128xf32>
    %cst_5 = arith.constant dense<0.000000e+00> : vector<16x128xf32>
    %5 = tpu.matmul %3, %4, %cst_5 {dimension_numbers = #tpu.dot_dimension_numbers<[1], [0], [0], [1], [0, 0, 1, 1], [], []>} : vector<16x128xf32>, vector<128x128xf32>, vector<16x128xf32> -> vector<16x128xf32>
    %c0_6 = arith.constant 0 : index
    %c0_7 = arith.constant 0 : index
    %6 = vector.load %arg4[%c0_6, %c0_7] : memref<16x128xf32, #tpu.memory_space<vmem>>, vector<16x128xf32>
    tpu.vector_store %arg4[%c0_6, %c0_7], %5 {strides = array<i32>} : memref<16x128xf32, #tpu.memory_space<vmem>>, vector<16x128xf32>,
    return
  }
  func.func @transform_0(%arg0: i32) -> (i32, i32) {
    %c0_i32 = arith.constant 0 : i32
    %c0_i32_0 = arith.constant 0 : i32
    %c0_i32_1 = arith.constant 0 : i32
    return %c0_i32, %c0_i32_0 : i32, i32
  }
  func.func @transform_1(%arg0: i32) -> (i32, i32) {
    %c0_i32 = arith.constant 0 : i32
    %c0_i32_0 = arith.constant 0 : i32
    return %arg0, %c0_i32 : i32, i32
  }
  func.func @transform_2(%arg0: i32) -> (i32, i32) {
    %c0_i32 = arith.constant 0 : i32
    %c0_i32_0 = arith.constant 0 : i32
    %c0_i32_1 = arith.constant 0 : i32
    return %c0_i32, %c0_i32_0 : i32, i32
  }
  func.func @transform_3(%arg0: i32) -> (i32, i32) {
    %c0_i32 = arith.constant 0 : i32
    %c0_i32_0 = arith.constant 0 : i32
    return %arg0, %c0_i32 : i32, i32
  }
}

</mosaic_0001>

<bundles_post_ra>
// kernel: _qnet_forward_pallas.1
= control target key start
LH: loop header
LB: loop body
LE: loop exit
PB: predicated region body
PF: predicated region fallthrough
CT: control target
= control target key end

     0   :  { %s262_s0 = inlined_call_operand.vmem [shape: f32[128,128], index: 0, kind: input, shape index: {}]   ;;  %s263_s2 = inlined_call_operand.vmem [shape: f32[128,128], index: 2, kind: input, shape index: {}]   ;;  %s264_s1 = inlined_call_operand.vmem [shape: f32[16,128], index: 1, kind: input, shape index: {}]   ;;  %s265_s3 = inlined_call_operand.vmem [shape: f32[16,128], index: 3, kind: output, shape index: {}]  }
   0x1   :  { %v31_v0 = vld [vmem:[%s262_s0 + $0x78] sm:$0xff]  ;;  %v30_v1 = vld [vmem:[%s262_s0 + $0x70] sm:$0xff]  ;;  %v29_v2 = vld [vmem:[%s262_s0 + $0x68] sm:$0xff] }
   0x2   :  { %102 = vmatpush.msra.mxu2 %v31_v0  ;;  %32 = vmatpush.msra.mxu0 %v31_v0  ;;  %v28_v3 = vld [vmem:[%s262_s0 + $0x60] sm:$0xff]  ;;  %v27_v4 = vld [vmem:[%s262_s0 + $0x58] sm:$0xff]  ;;  %v71_v6 = vld [vmem:[%s263_s2 + $0x70] sm:$0xff] }
   0x3   :  { %v72_v5 = vld [vmem:[%s263_s2 + $0x78] sm:$0xff]  ;;  %v26_v7 = vld [vmem:[%s262_s0 + $0x50] sm:$0xff]  ;;  %v70_v8 = vld [vmem:[%s263_s2 + $0x68] sm:$0xff] }
   0x4   :  { %103 = vmatpush.msra.mxu2 %v30_v1  ;;  %33 = vmatpush.msra.mxu0 %v30_v1  ;;  %v25_v9 = vld [vmem:[%s262_s0 + $0x48] sm:$0xff]  ;;  %v69_v10 = vld [vmem:[%s263_s2 + $0x60] sm:$0xff]  ;;  %v68_v12 = vld [vmem:[%s263_s2 + $0x58] sm:$0xff] }
   0x5   :  { %118 = vmatpush.msra.mxu3 %v72_v5  ;;  %73 = vmatpush.msra.mxu1 %v72_v5  ;;  %v24_v11 = vld [vmem:[%s262_s0 + $0x40] sm:$0xff]  ;;  %v23_v13 = vld [vmem:[%s262_s0 + $0x38] sm:$0xff]  ;;  %v67_v14 = vld [vmem:[%s263_s2 + $0x50] sm:$0xff] }
   0x6   :  { %104 = vmatpush.msra.mxu2 %v29_v2  ;;  %34 = vmatpush.msra.mxu0 %v29_v2  ;;  %v22_v15 = vld [vmem:[%s262_s0 + $0x30] sm:$0xff]  ;;  %v66_v16 = vld [vmem:[%s263_s2 + $0x48] sm:$0xff]  ;;  %v65_v18 = vld [vmem:[%s263_s2 + $0x40] sm:$0xff] }
   0x7   :  { %119 = vmatpush.msra.mxu3 %v71_v6  ;;  %74 = vmatpush.msra.mxu1 %v71_v6  ;;  %v21_v17 = vld [vmem:[%s262_s0 + $0x28] sm:$0xff]  ;;  %v20_v19 = vld [vmem:[%s262_s0 + $0x20] sm:$0xff]  ;;  %v64_v20 = vld [vmem:[%s263_s2 + $0x38] sm:$0xff] }
   0x8   :  { %105 = vmatpush.msra.mxu2 %v28_v3  ;;  %35 = vmatpush.msra.mxu0 %v28_v3  ;;  %v19_v21 = vld [vmem:[%s262_s0 + $0x18] sm:$0xff]  ;;  %v63_v22 = vld [vmem:[%s263_s2 + $0x30] sm:$0xff]  ;;  %v62_v24 = vld [vmem:[%s263_s2 + $0x28] sm:$0xff] }
   0x9   :  { %120 = vmatpush.msra.mxu3 %v70_v8  ;;  %75 = vmatpush.msra.mxu1 %v70_v8  ;;  %v18_v23 = vld [vmem:[%s262_s0 + $0x10] sm:$0xff]  ;;  %v17_v25 = vld [vmem:[%s262_s0 + $0x8] sm:$0xff]  ;;  %v61_v26 = vld [vmem:[%s263_s2 + $0x20] sm:$0xff] }
   0xa   :  { %106 = vmatpush.msra.mxu2 %v27_v4  ;;  %36 = vmatpush.msra.mxu0 %v27_v4  ;;  %v16_v27 = vld [vmem:[%s262_s0] sm:$0xff]  ;;  %v15_v28 = vld [vmem:[%s264_s1 + $0x8] sm:$0xff]  ;;  %v60_v30 = vld [vmem:[%s263_s2 + $0x18] sm:$0xff] }
   0xb   :  { %121 = vmatpush.msra.mxu3 %v69_v10  ;;  %76 = vmatpush.msra.mxu1 %v69_v10  ;;  %v14_v29 = vld [vmem:[%s264_s1] sm:$0xff]  ;;  %v59_v31 = vld [vmem:[%s263_s2 + $0x10] sm:$0xff]  ;;  %v58_v32 = vld [vmem:[%s263_s2 + $0x8] sm:$0xff] }
   0xc   :  { %107 = vmatpush.msra.mxu2 %v26_v7  ;;  %37 = vmatpush.msra.mxu0 %v26_v7  ;;  %v57_v33 = vld [vmem:[%s263_s2] sm:$0xff] }
   0xd   :  { %122 = vmatpush.msra.mxu3 %v68_v12  ;;  %77 = vmatpush.msra.mxu1 %v68_v12 }
   0xe   :  { %108 = vmatpush.msra.mxu2 %v25_v9  ;;  %38 = vmatpush.msra.mxu0 %v25_v9 }
   0xf   :  { %123 = vmatpush.msra.mxu3 %v67_v14  ;;  %78 = vmatpush.msra.mxu1 %v67_v14 }
  0x10   :  { %109 = vmatpush.msra.mxu2 %v24_v11  ;;  %39 = vmatpush.msra.mxu0 %v24_v11 }
  0x11   :  { %124 = vmatpush.msra.mxu3 %v66_v16  ;;  %79 = vmatpush.msra.mxu1 %v66_v16 }
  0x12   :  { %110 = vmatpush.msra.mxu2 %v23_v13  ;;  %40 = vmatpush.msra.mxu0 %v23_v13 }
  0x13   :  { %125 = vmatpush.msra.mxu3 %v65_v18  ;;  %80 = vmatpush.msra.mxu1 %v65_v18 }
  0x14   :  { %111 = vmatpush.msra.mxu2 %v22_v15  ;;  %41 = vmatpush.msra.mxu0 %v22_v15 }
  0x15   :  { %126 = vmatpush.msra.mxu3 %v64_v20  ;;  %81 = vmatpush.msra.mxu1 %v64_v20 }
  0x16   :  { %112 = vmatpush.msra.mxu2 %v21_v17  ;;  %42 = vmatpush.msra.mxu0 %v21_v17 }
  0x17   :  { %127 = vmatpush.msra.mxu3 %v63_v22  ;;  %82 = vmatpush.msra.mxu1 %v63_v22 }
  0x18   :  { %113 = vmatpush.msra.mxu2 %v20_v19  ;;  %43 = vmatpush.msra.mxu0 %v20_v19 }
  0x19   :  { %128 = vmatpush.msra.mxu3 %v62_v24  ;;  %83 = vmatpush.msra.mxu1 %v62_v24 }
  0x1a   :  { %114 = vmatpush.msra.mxu2 %v19_v21  ;;  %44 = vmatpush.msra.mxu0 %v19_v21 }
  0x1b   :  { %129 = vmatpush.msra.mxu3 %v61_v26  ;;  %84 = vmatpush.msra.mxu1 %v61_v26 }
  0x1c   :  { %115 = vmatpush.msra.mxu2 %v18_v23  ;;  %45 = vmatpush.msra.mxu0 %v18_v23 }
  0x1d   :  { %130 = vmatpush.msra.mxu3 %v60_v30  ;;  %85 = vmatpush.msra.mxu1 %v60_v30 }
  0x1e   :  { %116 = vmatpush.msra.mxu2 %v17_v25  ;;  %46 = vmatpush.msra.mxu0 %v17_v25 }
  0x1f   :  { %131 = vmatpush.msra.mxu3 %v59_v31  ;;  %86 = vmatpush.msra.mxu1 %v59_v31 }
  0x20   :  { %117 = vmatpush.msra.mxu2 %v16_v27  ;;  %47 = vmatpush.msra.mxu0 %v16_v27 }
  0x21   :  { %51 = vmatmul.f32.vlgmr.msra.gmra.mxu2 %v15_v28  ;;  %48 = vmatmul.f32.vlgmr.msra.gmra.mxu0 %v14_v29 }
  0x22   :  { %132 = vmatpush.msra.mxu3 %v58_v32  ;;  %87 = vmatpush.msra.mxu1 %v58_v32 }
  0x24   :  { %133 = vmatpush.msra.mxu3 %v57_v33  ;;  %88 = vmatpush.msra.mxu1 %v57_v33 }
  0x9e   :  { %v49_v34 = vpop.f32.mrf.mxu0 }
  0x9f   :  { %v55_v35 = vmul.f32 %v49_v34, %v49_v34 }
  0xa1   :  { %89 = vmatmul.f32.vlgmr.msra.gmra.mxu1 %v55_v35 }
  0xa4   :  { %v52_v36 = vpop.f32.mrf.mxu2 }
  0xa5   :  { %v56_v37 = vmul.f32 %v52_v36, %v52_v36 }
  0xa7   :  { %92 = vmatmul.f32.vlgmr.msra.gmra.mxu3 %v56_v37 }
 0x11e   :  { %v90_v38 = vpop.f32.mrf.mxu1 }
 0x11f   :  { %96 = vst [vmem:[%s265_s3] sm:$0xff] %v90_v38 }
 0x12a   :  { %v93_v39 = vpop.f32.mrf.mxu3 }
 0x12b   :  { %97 = vst [vmem:[%s265_s3 + $0x8] sm:$0xff] %v93_v39 }

</bundles_post_ra>
